<compile_context>
chip_gen: v5e
topology: v5e:2x2
jax: 0.10.0
libtpu: 0.0.40
codegen_flags: <defaults>
</compile_context>

<pallas_src>
import functools

import jax
import jax.numpy as jnp
from jax import lax
from jax.experimental import pallas as pl
from jax.experimental.pallas import tpu as pltpu


def _round_up(x, m):
    return (x + m - 1) // m * m


# ---------------------------------------------------------------------------
# Pallas kernels
# ---------------------------------------------------------------------------

def dense_kernel(x_ref, w_ref, b_ref, o_ref):
    """o = x @ w + b for one row tile of nodes (bf16 MXU, f32 accumulate)."""
    o_ref[...] = (
        jnp.dot(x_ref[...], w_ref[...], preferred_element_type=jnp.float32)
        + b_ref[...]
    ).astype(o_ref.dtype)


def diffuse_relu_dense_kernel(p_ref, h_ref, w_ref, b_ref, o_ref, acc_ref):
    """o = relu(P_tile @ H0) @ W2 + b2, contraction tiled over the k grid axis.

    p_ref:  (tm, tk) bf16 block of P = ((1-alpha)I + alpha*A_hat)^K.
    h_ref:  (tk, HIDp) bf16 block of H0.
    acc_ref:(tm, HIDp) f32 accumulator scratch (persists across k steps).
    """
    k = pl.program_id(1)

    @pl.when(k == 0)
    def _():
        acc_ref[...] = jnp.zeros_like(acc_ref)

    acc_ref[...] += jnp.dot(p_ref[...], h_ref[...],
                            preferred_element_type=jnp.float32)

    @pl.when(k == pl.num_programs(1) - 1)
    def _():
        h1 = jnp.maximum(acc_ref[...], 0.0).astype(w_ref.dtype)
        # TODO(synk): F.dropout(training=self.training) is identity in eval
        # mode; training-mode dropout would use pltpu.prng_seed/prng_random_bits.
        o_ref[...] = (
            jnp.dot(h1, w_ref[...], preferred_element_type=jnp.float32)
            + b_ref[...]
        ).astype(o_ref.dtype)


def diffuse_logsoftmax_kernel(p_ref, z_ref, o_ref, acc_ref, *, valid_cols):
    """o = log_softmax(P_tile @ Z0, axis=1), contraction tiled, padded lanes
    masked in f32 before the normalizer."""
    k = pl.program_id(1)

    @pl.when(k == 0)
    def _():
        acc_ref[...] = jnp.zeros_like(acc_ref)

    acc_ref[...] += jnp.dot(p_ref[...], z_ref[...],
                            preferred_element_type=jnp.float32)

    @pl.when(k == pl.num_programs(1) - 1)
    def _():
        z = acc_ref[...]
        lane = lax.broadcasted_iota(jnp.int32, z.shape, dimension=1)
        z = jnp.where(lane < valid_cols, z, jnp.float32(-1e30))
        m = jnp.max(z, axis=1, keepdims=True)
        lse = jnp.log(jnp.sum(jnp.exp(z - m), axis=1, keepdims=True))
        o_ref[...] = z - m - lse


# ---------------------------------------------------------------------------
# Plain-JAX glue (graph preprocessing, analogous to PyG gcn_norm + cached=True)
# ---------------------------------------------------------------------------

def gcn_norm_adj(edge_index, num_nodes):
    """Dense D^-1/2 (A + I) D^-1/2 from a (2, E) edge_index."""
    src, dst = edge_index[0], edge_index[1]
    a = jnp.zeros((num_nodes, num_nodes), jnp.float32)
    a = a.at[src, dst].set(1.0)
    idx = jnp.arange(num_nodes)
    a = a.at[idx, idx].set(1.0)  # remaining self loops (no double-counting)
    deg = jnp.sum(a, axis=1)
    dinv = jnp.where(deg > 0, 1.0 / jnp.sqrt(deg), 0.0)
    return dinv[:, None] * a * dinv[None, :]


def diffusion_operator(edge_index, num_nodes, *, alpha, K, n_pad):
    """P = ((1-alpha)*I + alpha*A_hat)^K, zero-padded to (n_pad, n_pad), bf16.

    Residual scaling folded into the operator once; K steps collapsed via
    repeated squaring (exactly equal, in exact arithmetic, to K iterations of
    h <- (1-alpha)*h + alpha*A_hat @ h).
    """
    a_hat = gcn_norm_adj(edge_index, num_nodes)
    m = (1.0 - alpha) * jnp.eye(num_nodes, dtype=jnp.float32) + alpha * a_hat
    p = jnp.eye(num_nodes, dtype=jnp.float32)
    base, k = m, int(K)
    while k > 0:
        if k & 1:
            p = p @ base
        k >>= 1
        if k:
            base = base @ base
    p_pad = jnp.zeros((n_pad, n_pad), jnp.float32).at[:num_nodes, :num_nodes].set(p)
    return p_pad.astype(jnp.bfloat16)


def _pad_params(params, in_pad, hid_pad, out_pad):
    w1, b1, w2, b2 = params["w1"], params["b1"], params["w2"], params["b2"]
    in_c, hid = w1.shape
    out_c = w2.shape[1]
    w1p = jnp.zeros((in_pad, hid_pad), jnp.float32).at[:in_c, :hid].set(w1)
    b1p = jnp.zeros((1, hid_pad), jnp.float32).at[:, :hid].set(b1)
    w2p = jnp.zeros((hid_pad, out_pad), jnp.float32).at[:hid, :out_c].set(w2)
    b2p = jnp.zeros((1, out_pad), jnp.float32).at[:, :out_c].set(b2)
    return (w1p.astype(jnp.bfloat16), b1p,
            w2p.astype(jnp.bfloat16), b2p)


def _device_defaults():
    """Per-chip tile / VMEM defaults (v5e & v6e: 128 MiB VMEM; v7x: 64 MiB)."""
    try:
        kind = jax.devices()[0].device_kind.lower()
    except Exception:  # pragma: no cover
        kind = ""
    if "v5" in kind or "v6" in kind:
        return dict(row_tile=512, k_tile=2048, vmem_limit=100 * 1024 * 1024)
    # v7x / unknown: conservative, fits 64 MiB physical VMEM per TensorCore.
    return dict(row_tile=256, k_tile=1024, vmem_limit=48 * 1024 * 1024)


def _choose_tiles(n, row_tile, k_tile):
    """Pick (tm, tk, n_pad): tk multiple of 128, tm multiple of 16 dividing
    n_pad, preferring >= 2 row tiles so both TensorCores get work."""
    n128 = _round_up(n, 128)
    if n128 <= k_tile:
        tk, n_pad = n128, n128
    else:
        tk = k_tile
        n_pad = _round_up(n, tk)

    tm = None
    cand = min(row_tile, n_pad)
    while cand >= 16:
        if cand % 16 == 0 and n_pad % cand == 0 and (n_pad // cand) >= 2:
            tm = cand
            break
        cand //= 2
    if tm is None:
        tm = 128  # always divides n_pad (n_pad is a multiple of 128)
    return tm, tk, n_pad


# ---------------------------------------------------------------------------
# Forward pass
# ---------------------------------------------------------------------------

def net_forward(x, edge_index, params, *, alpha, K,
                row_tile=None, k_tile=None, vmem_limit=None):
    n, in_c = x.shape
    hid = params["w1"].shape[1]
    out_c = params["w2"].shape[1]

    defaults = _device_defaults()
    row_tile = defaults["row_tile"] if row_tile is None else row_tile
    k_tile = defaults["k_tile"] if k_tile is None else k_tile
    vmem_limit = defaults["vmem_limit"] if vmem_limit is None else vmem_limit

    tm, tk, n_pad = _choose_tiles(n, row_tile, k_tile)
    n_tiles = n_pad // tm
    nk_tiles = n_pad // tk
    in_pad = _round_up(in_c, 128)
    hid_pad = _round_up(hid, 128)
    out_pad = _round_up(out_c, 128)

    p = diffusion_operator(edge_index, n, alpha=alpha, K=K, n_pad=n_pad)
    w1p, b1p, w2p, b2p = _pad_params(params, in_pad, hid_pad, out_pad)
    x_pad = (jnp.zeros((n_pad, in_pad), jnp.float32)
             .at[:n, :in_c].set(x).astype(jnp.bfloat16))

    cparams_row = pltpu.CompilerParams(
        dimension_semantics=("parallel",),
        vmem_limit_bytes=vmem_limit,
    )
    cparams_rk = pltpu.CompilerParams(
        dimension_semantics=("parallel", "arbitrary"),
        vmem_limit_bytes=vmem_limit,
    )

    # --- stage 1: H0 = X @ W1 + b1 (bf16, lane-dense) ------------------------
    h0 = pl.pallas_call(
        dense_kernel,
        out_shape=jax.ShapeDtypeStruct((n_pad, hid_pad), jnp.bfloat16),
        grid=(n_tiles,),
        in_specs=[pl.BlockSpec((tm, in_pad), lambda i: (i, 0)),
                  pl.BlockSpec((in_pad, hid_pad), lambda i: (0, 0)),
                  pl.BlockSpec((1, hid_pad), lambda i: (0, 0))],
        out_specs=pl.BlockSpec((tm, hid_pad), lambda i: (i, 0)),
        compiler_params=cparams_row,
        cost_estimate=pl.CostEstimate(
            flops=2 * n_pad * in_pad * hid_pad,
            transcendentals=0,
            bytes_accessed=2 * n_pad * in_pad + 2 * in_pad * hid_pad
                           + 4 * hid_pad + 2 * n_pad * hid_pad),
    )(x_pad, w1p, b1p)

    # --- stage 2: Z0 = relu(P @ H0) @ W2 + b2 (k-tiled contraction) ----------
    z0 = pl.pallas_call(
        diffuse_relu_dense_kernel,
        out_shape=jax.ShapeDtypeStruct((n_pad, out_pad), jnp.bfloat16),
        grid=(n_tiles, nk_tiles),
        in_specs=[pl.BlockSpec((tm, tk), lambda i, k: (i, k)),        # P block
                  pl.BlockSpec((tk, hid_pad), lambda i, k: (k, 0)),   # H0 block
                  pl.BlockSpec((hid_pad, out_pad), lambda i, k: (0, 0)),
                  pl.BlockSpec((1, out_pad), lambda i, k: (0, 0))],
        out_specs=pl.BlockSpec((tm, out_pad), lambda i, k: (i, 0)),
        scratch_shapes=[pltpu.VMEM((tm, hid_pad), jnp.float32)],
        compiler_params=cparams_rk,
        cost_estimate=pl.CostEstimate(
            flops=2 * n_pad * n_pad * hid_pad + 2 * n_pad * hid_pad * out_pad,
            transcendentals=0,
            bytes_accessed=2 * n_pad * n_pad
                           + 2 * n_pad * hid_pad * n_tiles
                           + 2 * hid_pad * out_pad + 4 * out_pad
                           + 2 * n_pad * out_pad),
    )(p, h0, w2p, b2p)

    # --- stage 3: out = log_softmax(P @ Z0) (k-tiled contraction) ------------
    out = pl.pallas_call(
        functools.partial(diffuse_logsoftmax_kernel, valid_cols=out_c),
        out_shape=jax.ShapeDtypeStruct((n_pad, out_pad), jnp.float32),
        grid=(n_tiles, nk_tiles),
        in_specs=[pl.BlockSpec((tm, tk), lambda i, k: (i, k)),        # P block
                  pl.BlockSpec((tk, out_pad), lambda i, k: (k, 0))],  # Z0 block
        out_specs=pl.BlockSpec((tm, out_pad), lambda i, k: (i, 0)),
        scratch_shapes=[pltpu.VMEM((tm, out_pad), jnp.float32)],
        compiler_params=cparams_rk,
        cost_estimate=pl.CostEstimate(
            flops=2 * n_pad * n_pad * out_pad,
            transcendentals=n_pad * out_pad,
            bytes_accessed=2 * n_pad * n_pad
                           + 2 * n_pad * out_pad * n_tiles
                           + 4 * n_pad * out_pad),
    )(p, z0)

    return out[:n, :out_c]


def reference_forward(x, edge_index, params, *, alpha, K):
    """Plain-JAX reference mirroring the kernel math (P = M^K, bf16 MXU
    operands, f32 accumulation).  M^K equals K residual diffusion steps in
    exact arithmetic."""
    n = x.shape[0]
    p = diffusion_operator(edge_index, n, alpha=alpha, K=K, n_pad=n)
    w1 = params["w1"].astype(jnp.bfloat16)
    w2 = params["w2"].astype(jnp.bfloat16)
    h0 = (jnp.dot(x.astype(jnp.bfloat16), w1,
                  preferred_element_type=jnp.float32)
          + params["b1"]).astype(jnp.bfloat16)
    h1 = jnp.maximum(jnp.dot(p, h0, preferred_element_type=jnp.float32), 0.0)
    z0 = (jnp.dot(h1.astype(jnp.bfloat16), w2,
                  preferred_element_type=jnp.float32)
          + params["b2"]).astype(jnp.bfloat16)
    z = jnp.dot(p, z0, preferred_element_type=jnp.float32)
    return jax.nn.log_softmax(z, axis=1)


if __name__ == "__main__":
    # Small synthetic problem: Net(in_channels, out_channels, hidden, alpha, K)
    N, IN_C, HID, OUT_C = 8, 16, 32, 8
    ALPHA, K = 0.1, 4
    NUM_EDGES = 24

    key = jax.random.PRNGKey(0)
    kx, ke, k1, k2, k3, k4 = jax.random.split(key, 6)

    x = jax.random.normal(kx, (N, IN_C), jnp.float32)
    edge_index = jax.random.randint(ke, (2, NUM_EDGES), 0, N, jnp.int32)

    params = {
        "w1": jax.random.normal(k1, (IN_C, HID), jnp.float32) / jnp.sqrt(IN_C),
        "b1": jax.random.normal(k2, (1, HID), jnp.float32) * 0.01,
        "w2": jax.random.normal(k3, (HID, OUT_C), jnp.float32) / jnp.sqrt(HID),
        "b2": jax.random.normal(k4, (1, OUT_C), jnp.float32) * 0.01,
    }

    out = net_forward(x, edge_index, params, alpha=ALPHA, K=K)
    out = jax.block_until_ready(out)

    ref = reference_forward(x, edge_index, params, alpha=ALPHA, K=K)
    if not jnp.allclose(out, ref, atol=1e-2, rtol=1e-2):
        err = float(jnp.max(jnp.abs(out - ref)))
        raise AssertionError(
            f"Pallas output does not match JAX reference (max abs err {err})")

    print("KERNEL_OK")
</pallas_src>

<mosaic_0001>
module attributes {stable_mosaic.version = 11 : i64} {
  func.func @dense_kernel(%arg0: i32, %arg1: memref<64x128xbf16, #tpu.memory_space<vmem>>, %arg2: memref<128x128xbf16, #tpu.memory_space<vmem>>, %arg3: memref<1x128xf32, #tpu.memory_space<vmem>>, %arg4: memref<64x128xbf16, #tpu.memory_space<vmem>>) attributes {dimension_semantics = [#tpu.dimension_semantics<parallel>], iteration_bounds = array<i64: 2>, scalar_prefetch = 0 : i64, scratch_operands = 0 : i64, tpu.core_type = #tpu.core_type<tc>, window_params = [{transform_indices = @transform_0, window_bounds = array<i64: 64, 128>}, {pipeline_mode = #tpu.pipeline_mode<synchronous>, transform_indices = @transform_1, window_bounds = array<i64: 128, 128>}, {pipeline_mode = #tpu.pipeline_mode<synchronous>, transform_indices = @transform_2, window_bounds = array<i64: 1, 128>}, {transform_indices = @transform_3, window_bounds = array<i64: 64, 128>}]} {
    %c0 = arith.constant 0 : index
    %c0_0 = arith.constant 0 : index
    %0 = vector.load %arg1[%c0, %c0_0] : memref<64x128xbf16, #tpu.memory_space<vmem>>, vector<64x128xbf16>
    %c0_1 = arith.constant 0 : index
    %c0_2 = arith.constant 0 : index
    %1 = vector.load %arg2[%c0_1, %c0_2] : memref<128x128xbf16, #tpu.memory_space<vmem>>, vector<128x128xbf16>
    %cst = arith.constant dense<0.000000e+00> : vector<64x128xf32>
    %2 = tpu.matmul %0, %1, %cst {dimension_numbers = #tpu.dot_dimension_numbers<[1], [0], [0], [1], [0, 0, 1, 1], [], []>} : vector<64x128xbf16>, vector<128x128xbf16>, vector<64x128xf32> -> vector<64x128xf32>
    %c0_3 = arith.constant 0 : index
    %c0_4 = arith.constant 0 : index
    %3 = vector.load %arg3[%c0_3, %c0_4] : memref<1x128xf32, #tpu.memory_space<vmem>>, vector<1x128xf32>
    %4 = vector.broadcast %3 : vector<1x128xf32> to vector<64x128xf32>
    %5 = arith.addf %2, %4 : vector<64x128xf32>
    %6 = arith.truncf %5 : vector<64x128xf32> to vector<64x128xbf16>
    %c0_5 = arith.constant 0 : index
    %c0_6 = arith.constant 0 : index
    %7 = vector.load %arg4[%c0_5, %c0_6] : memref<64x128xbf16, #tpu.memory_space<vmem>>, vector<64x128xbf16>
    tpu.vector_store %arg4[%c0_5, %c0_6], %6 {strides = array<i32>} : memref<64x128xbf16, #tpu.memory_space<vmem>>, vector<64x128xbf16>,
    return
  }
  func.func @transform_0(%arg0: i32) -> (i32, i32) {
    %c0_i32 = arith.constant 0 : i32
    %c0_i32_0 = arith.constant 0 : i32
    return %arg0, %c0_i32 : i32, i32
  }
  func.func @transform_1(%arg0: i32) -> (i32, i32) {
    %c0_i32 = arith.constant 0 : i32
    %c0_i32_0 = arith.constant 0 : i32
    %c0_i32_1 = arith.constant 0 : i32
    return %c0_i32, %c0_i32_0 : i32, i32
  }
  func.func @transform_2(%arg0: i32) -> (i32, i32) {
    %c0_i32 = arith.constant 0 : i32
    %c0_i32_0 = arith.constant 0 : i32
    %c0_i32_1 = arith.constant 0 : i32
    return %c0_i32, %c0_i32_0 : i32, i32
  }
  func.func @transform_3(%arg0: i32) -> (i32, i32) {
    %c0_i32 = arith.constant 0 : i32
    %c0_i32_0 = arith.constant 0 : i32
    return %arg0, %c0_i32 : i32, i32
  }
}

</mosaic_0001>

<bundles_post_ra>
// kernel: tpu_custom_call.1
= control target key start
LH: loop header
LB: loop body
LE: loop exit
PB: predicated region body
PF: predicated region fallthrough
CT: control target
= control target key end

     0   :  { %8 = vsyncpa [#allocation3], 0  ;;  %s955_s0 = inlined_call_operand.hbm [shape: bf16[128,128], index: 0, kind: input, shape index: {}]   ;;  %s956_s1 = inlined_call_operand.hbm [shape: bf16[128,128], index: 1, kind: input, shape index: {}]   ;;  %s957_s2 = inlined_call_operand.vmem [shape: f32[1,128], index: 2, kind: input, shape index: {}]   ;;  %s958_s3 = inlined_call_operand.hbm [shape: bf16[128,128], index: 3, kind: output, shape index: {}]  }
   0x1   :  { %10 = vsyncpa [#allocation3 + $0x1], 0 }
   0x2   :  { %11 = vsyncpa [#allocation6], 0 }
   0x3   :  { %12 = vsyncpa [#allocation4], 0 }
   0x4   :  { %14 = vsyncpa [#allocation4 + $0x1], 0  ;;  %s798_s12 = smov 0   ;;  %s800_s13 = smov 0  }
   0x5   :  { %s802_s14 = smov 0   ;;  %s804_s15 = smov 0  }
   0x6 LB: > { %s819_s16 = sadd.s32 4294967295, %s771_s15   ;;  %s454_s17 = sadd.s32 4294967294, %s771_s15   ;;  %s771_s15 = sphi %s804_s15, %s968_s15   ;;  %s767_s14 = sphi %s802_s14, %s967_s14   ;;  %s763_s13 = sphi %s800_s13, %s966_s13   ;;  %s759_s12 = sphi %s798_s12, %s965_s12  }
   0x7   : > { %p40_p0 = scmp.ne.s32.totalorder %s763_s13, %s759_s12  ;;  %p41_p1 = scmp.eq.s32.totalorder %s819_s16, 0 }
   0x8   : > { %p106_p2 = scmp.eq.s32.totalorder %s819_s16, 1  ;;  %p112_p3 = scmp.eq.s32.totalorder %s454_s17, 1 }
   0x9   : > { %p828_p4 = por %p41_p1, %p40_p0  ;;  %p455_p5 = scmp.ge.s32.totalorder %s771_s15, 1 }
   0xa   : > { %p833_p6 = por %p112_p3, %p40_p0  ;;  %p119_p7 = scmp.lt.s32.totalorder %s771_s15, 3 }
   0xb   : > { %s130_s22 = sshll.u32 %s956_s1, 4  ;;  %s773_s24 = smov [#allocation5]   ;;  %s131_s22 = int_to_ptr.hbm [resolvable:$true] %s130_s22 }
   0xc   : > { %p841_p8 = pnand %p455_p5, %p119_p7  ;;  %s132_s25 = sshll.u32 %s773_s24, 4  ;;  %s133_s25 = int_to_ptr.vmem [resolvable:$true] %s132_s25 }
   0xd   : > { %s851_s26 = sadd.s32 1, %s771_s15   ;;  %s774_s27 = smov 64  }
   0xe   : > { %p587_p9 = pneg %p841_p8  ;;  %s775_s28 = smov 4  }
   0xf   : > { %s24_s29 = ssub.s32 %s771_s15, %s851_s26  ;;  %s27_s30 = sadd.s32 1, %s767_s14 }
  0x10   : > { %p588_p10 = pnand %p587_p9, %p41_p1  ;;  %p25_p12 = scmp.eq.s32.totalorder %s24_s29, 0 }
  0x11   : > { %p34_p13 = scmp.ne.s32.totalorder %s767_s14, %s763_s13  ;;  %p35_p0 = scmp.eq.s32.totalorder %s771_s15, 0 }
  0x12   : > { %590 = dma.hbm_to_vmem [thread:$0]  (!%p588_p10), %s131_s22, 1024, %s133_s25, [#allocation6], %s774_s27, %s774_s27, %s775_s28  }
  0x13   : > { %s863_s4 = scalar_select %p25_p12, %s767_s14, %s27_s30  }
  0x14   : > { %p867_p3 = por %p106_p2, %p34_p13  ;;  %p600_p5 = scmp.lt.s32.totalorder %s771_s15, 2 }
  0x15   : > { %s149_s6 = sand.u32 1, %s767_s14   ;;  %s518_s7 = sshll.u32 %s771_s15, 5 }
  0x16   : > { %p36_p7 = por %p35_p0, %p34_p13  ;;  %s458_s8 = sshll.u32 %s149_s6, 5 }
  0x17   : > { %s158_s11 = scalar_lea.hbm %s955_s0, %s518_s7  ;;  %s153_s20 = scalar_lea.vmem [#allocation2], %s458_s8 }
  0x18   : > { %s159_s17 = sshll.u32 %s158_s11, 4  ;;  %s161_s21 = sshll.u32 %s153_s20, 4  ;;  %s160_s17 = int_to_ptr.hbm [resolvable:$true] %s159_s17  ;;  %s162_s21 = int_to_ptr.vmem [resolvable:$true] %s161_s21 }
  0x19   : > { %p877_p9 = pnand %p600_p5, %p36_p7  ;;  %s150_s24 = scalar_lea.sflag [#allocation3], %s149_s6 }
  0x1a   : > { %s671_s25 = sshra.s32 %s160_s17, 4  ;;  %s678_s8 = scalar_lea.hbm %s955_s0, 64  ;;  %s672_s25 = int_to_ptr.hbm [resolvable:$true] %s671_s25 }
  0x1b   : > { %s673_s29 = scalar_lea.hbm %s672_s25, 32  ;;  %p675_p10 = pneg %p877_p9 }
  0x1c   : > { %p674_p2 = scmp.ne.s32.totalorder %s672_s25, %s673_s29  ;;  %p679_p0 = scmp.lt.s32.totalorder %s672_s25, %s955_s0 }
  0x1d   : > { %p680_p5 = scmp.lt.s32.totalorder %s678_s8, %s673_s29 }
  0x1e   : > { %p676_p12 = pnand %p675_p10, %p674_p2 }
  0x1f   : > { %p681_p7 = por %p680_p5, %p679_p0 }
  0x20   : > { %p677_p13 = pneg %p676_p12 }
  0x22   : > { %p682_p11 = pnand %p681_p7, %p677_p13 }
  0x24   : > { %685 = shalt.err (!%p682_p11)
}
  0x25   : > { %594 = dma.hbm_to_vmem [thread:$0]  (!%p877_p9), %s160_s17, 512, %s162_s21, %s150_s24, %s774_s27, %s774_s27, %s775_s28  }
  0x26   : > { %173 = sbr.rel (%p841_p8) target bundleno = 228 (0xe4), region = 32  ;;  %s897_s6 = sand.u32 (!%p841_p8), 1, %s763_s13  }
  0x27   : > { %s462_s11 = sshll.u32 (!%p841_p8), %s897_s6, 5  ;;  %s176_s20 = scalar_lea.sflag (!%p841_p8), [#allocation3], %s897_s6 }
  0x28   : > { %s903_s25 = scalar_lea.vmem (!%p841_p8), [#allocation2], %s462_s11 }
  0x2b   : > { %746 = dma.done.wait (%p828_p4), %s176_s20, 512  }
  0x2c   : > { %748 = vsyncadd (%p828_p4), %s176_s20, 4294966784 }
  0x2d   : > { %750 = dma.done.wait (%p41_p1), [#allocation6], 1024  }
  0x2e   : > { %752 = vsyncadd (%p41_p1), [#allocation6], 4294966272  ;;  %v530_v0 = vld [vmem:[#allocation5 + $0x38] sm:$0xff]  ;;  %v529_v1 = vld [vmem:[#allocation5 + $0x30] sm:$0xff]  ;;  %s531_s27 = sshll.u32 %s819_s16, 5  ;;  %s207_s22 = scalar_lea.vmem [#allocation7], %s462_s11 }
  0x2f   : > { %310 = vmatpush.bf16.msra.mxu0 %v530_v0  ;;  %555 = vmatpush.bf16.msra.mxu1 %v530_v0  ;;  %v528_v2 = vld [vmem:[#allocation5 + $0x28] sm:$0xff]  ;;  %v527_v3 = vld [vmem:[#allocation5 + $0x20] sm:$0xff]  ;;  %v526_v4 = vld [vmem:[#allocation5 + $0x18] sm:$0xff]  ;;  %s367_s21 = scalar_lea.hbm %s958_s3, %s531_s27  ;;  %s368_s24 = sshll.u32 %s207_s22, 4  ;;  %s369_s24 = int_to_ptr.vmem [resolvable:$true] %s368_s24 }
  0x30   : > { %556 = vmatpush.bf16.msra.mxu2 %v530_v0  ;;  %557 = vmatpush.bf16.msra.mxu3 %v530_v0  ;;  %v525_v5 = vld [vmem:[#allocation5 + $0x10] sm:$0xff]  ;;  %v524_v6 = vld [vmem:[#allocation5 + $0x8] sm:$0xff]  ;;  %v523_v7 = vld [vmem:[#allocation5] sm:$0xff]  ;;  %s370_s29 = sshll.u32 %s367_s21, 4  ;;  %s356_s16 = scalar_lea.sflag [#allocation4], %s897_s6  ;;  %s371_s29 = int_to_ptr.hbm [resolvable:$true] %s370_s29 }
  0x31   : > { %v519_v8 = vld [vmem:[%s903_s25] sm:$0xff]  ;;  %v520_v9 = vld [vmem:[%s903_s25 + $0x8] sm:$0xff]  ;;  %v521_v10 = vld [vmem:[%s903_s25 + $0x10] sm:$0xff]  ;;  %s715_s30 = sshra.s32 %s371_s29, 4  ;;  %s721_s10 = scalar_lea.hbm %s958_s3, 64  ;;  %s716_s30 = int_to_ptr.hbm [resolvable:$true] %s715_s30 }
  0x32   : > { %v522_v11 = vld [vmem:[%s903_s25 + $0x18] sm:$0xff]  ;;  %v640_v14 = vld [vmem:[%s957_s2] ss:$0 sm:$0xff]  ;;  %s717_s7 = scalar_lea.hbm %s716_s30, 32  ;;  %p722_p11 = scmp.lt.s32.totalorder %s716_s30, %s958_s3 }
  0x33   : > { %311 = vmatpush.bf16.msra.mxu0 %v529_v1  ;;  %558 = vmatpush.bf16.msra.mxu1 %v529_v1  ;;  %p718_p1 = scmp.ne.s32.totalorder %s716_s30, %s717_s7  ;;  %p723_p9 = scmp.lt.s32.totalorder %s721_s10, %s717_s7 }
  0x34   : > { %559 = vmatpush.bf16.msra.mxu2 %v529_v1  ;;  %560 = vmatpush.bf16.msra.mxu3 %v529_v1 }
  0x35   : > { %p719_p4 = pnand %p718_p1, %p867_p3  ;;  %p724_p2 = por %p723_p9, %p722_p11 }
  0x37   : > { %312 = vmatpush.bf16.msra.mxu0 %v528_v2  ;;  %561 = vmatpush.bf16.msra.mxu1 %v528_v2  ;;  %p720_p8 = pneg %p719_p4 }
  0x38   : > { %562 = vmatpush.bf16.msra.mxu2 %v528_v2  ;;  %563 = vmatpush.bf16.msra.mxu3 %v528_v2 }
  0x39   : > { %p725_p10 = pnand %p724_p2, %p720_p8 }
  0x3b   : > { %313 = vmatpush.bf16.msra.mxu0 %v527_v3  ;;  %564 = vmatpush.bf16.msra.mxu1 %v527_v3 }
  0x3c   : > { %565 = vmatpush.bf16.msra.mxu2 %v527_v3  ;;  %566 = vmatpush.bf16.msra.mxu3 %v527_v3 }
  0x3f   : > { %314 = vmatpush.bf16.msra.mxu0 %v526_v4  ;;  %567 = vmatpush.bf16.msra.mxu1 %v526_v4 }
  0x40   : > { %568 = vmatpush.bf16.msra.mxu2 %v526_v4  ;;  %569 = vmatpush.bf16.msra.mxu3 %v526_v4 }
  0x43   : > { %315 = vmatpush.bf16.msra.mxu0 %v525_v5  ;;  %570 = vmatpush.bf16.msra.mxu1 %v525_v5 }
  0x44   : > { %571 = vmatpush.bf16.msra.mxu2 %v525_v5  ;;  %572 = vmatpush.bf16.msra.mxu3 %v525_v5 }
  0x47   : > { %316 = vmatpush.bf16.msra.mxu0 %v524_v6  ;;  %573 = vmatpush.bf16.msra.mxu1 %v524_v6 }
  0x48   : > { %574 = vmatpush.bf16.msra.mxu2 %v524_v6  ;;  %575 = vmatpush.bf16.msra.mxu3 %v524_v6 }
  0x4b   : > { %317 = vmatpush.bf16.msra.mxu0 %v523_v7  ;;  %576 = vmatpush.bf16.msra.mxu1 %v523_v7 }
  0x4c   : > { %577 = vmatpush.bf16.msra.mxu2 %v523_v7  ;;  %578 = vmatpush.bf16.msra.mxu3 %v523_v7 }
  0x4e   : > { %318 = vmatmul.bf16.vlgmr.msra.gmra.mxu0 %v519_v8  ;;  %323 = vmatmul.bf16.vlgmr.msra.gmra.mxu1 %v520_v9 }
  0x4f   : > { %328 = vmatmul.bf16.vlgmr.msra.gmra.mxu2 %v521_v10  ;;  %333 = vmatmul.bf16.vlgmr.msra.gmra.mxu3 %v522_v11 }
  0xcb   : > { %v319_v12 = vpop.f32.mrf.mxu0  ;;  %v324_v13 = vpop.f32.mrf.mxu1 }
  0xcc   : > { %v320_v19 = vadd.f32 %v640_v14, %v319_v12  ;;  %v325_v20 = vadd.f32 %v640_v14, %v324_v13 }
  0xd2   : > { %v329_v15 = vpop.f32.mrf.mxu2  ;;  %v334_v16 = vpop.f32.mrf.mxu3 }
  0xd3   : > { %v321_v17 = vpop.f32.mrf.mxu0  ;;  %v326_v18 = vpop.f32.mrf.mxu1  ;;  %v330_v27 = vadd.f32 %v640_v14, %v329_v15  ;;  %v335_v28 = vadd.f32 %v640_v14, %v334_v16 }
  0xd4   : > { %v322_v21 = vadd.f32 %v640_v14, %v321_v17  ;;  %v327_v22 = vadd.f32 %v640_v14, %v326_v18 }
  0xd6   : > { %v535_v23 = vpack.c.bf16 %v322_v21, %v320_v19  ;;  %v540_v24 = vpack.c.bf16 %v327_v22, %v325_v20 }
  0xd8   : > { %536 = vst [vmem:[%s207_s22] sm:$0xff] %v535_v23  }
  0xd9   : > { %552 = vst [vmem:[%s207_s22 + $0x8] sm:$0xff] %v540_v24  }
  0xda   : > { %v331_v25 = vpop.f32.mrf.mxu2  ;;  %v336_v26 = vpop.f32.mrf.mxu3 }
  0xdb   : > { %v332_v29 = vadd.f32 %v640_v14, %v331_v25  ;;  %v337_v30 = vadd.f32 %v640_v14, %v336_v26 }
  0xdd   : > { %v545_v31 = vpack.c.bf16 %v332_v29, %v330_v27  ;;  %v550_v32 = vpack.c.bf16 %v337_v30, %v335_v28 }
  0xdf   : > { %553 = vst [vmem:[%s207_s22 + $0x10] sm:$0xff] %v545_v31  }
  0xe0   : > { %554 = vst [vmem:[%s207_s22 + $0x18] sm:$0xff] %v550_v32  }
  0xe1   : > { %728 = shalt.err (!%p725_p10)
}
  0xe2   : > { %s776_s6 = smov 64   ;;  %s777_s25 = smov 4  }
  0xe3   : > { %585 = dma.vmem_to_hbm [thread:$0]  (%p867_p3), %s369_s24, 512, %s371_s29, %s356_s16, %s776_s6, %s776_s6, %s777_s25  }
  0xe4 PF: > { %s385_s18 = sand.u32 1, %s759_s12   ;;  %p964_p12 = scmp.ge.s32.totalorder %s771_s15, 2 }
  0xe5   : > { %s386_s23 = scalar_lea.sflag [#allocation4], %s385_s18 }
  0xe6   : > { %p596_p13 = pnand %p964_p12, %p833_p6 }
  0xe8   : > { %p597_p0 = pneg %p596_p13 }
  0xea   : > { %754 = dma.done.wait (%p597_p0), %s386_s23, 512  }
  0xeb   : > { %756 = vsyncadd (%p597_p0), %s386_s23, 4294966784  ;;  %p17_p5 = scmp.ge.s32.totalorder %s851_s26, 4   ;;  %s965_s12 = smov %s763_s13 }
  0xec   : > { %s966_s13 = smov %s767_s14  ;;  %s967_s14 = smov %s863_s4 }
  0xed   : > { %s968_s15 = smov %s851_s26  ;;  %19 = sbr.rel (!%p17_p5) target bundleno = 6 (0x6), region = 81 }
  0xf2   :  { %392 = vsyncpa [#allocation3], 1 }
  0xf3   :  { %394 = vsyncpa [#allocation3 + $0x1], 1 }
  0xf4   :  { %395 = vsyncpa [#allocation6], 1 }
  0xf5   :  { %396 = vsyncpa [#allocation4], 1 }
  0xf6   :  { %398 = vsyncpa [#allocation4 + $0x1], 1 }

</bundles_post_ra>
